<compile_context>
chip_gen: v5e
topology: v5e:2x2
jax: 0.10.0
libtpu: 0.0.40
codegen_flags: <defaults>
</compile_context>

<pallas_src>
import numpy as np
import jax
import jax.numpy as jnp
from jax import lax
from jax.experimental import pallas as pl
from jax.experimental.pallas import tpu as pltpu


def _round_up(x, m):
    return (x + m - 1) // m * m


# ---------------------------------------------------------------------------
# Pallas kernel 1: 1x1 convolution ("reduce") on a channels-minor pixel tile.
# ---------------------------------------------------------------------------
def _conv1x1_kernel(w_ref, b_ref, x_ref, o_ref):
    # w_ref: SMEM (C_out*C_in,)   b_ref: SMEM (C_out,)
    # x_ref: VMEM (1, C_in, TP)   o_ref: VMEM (1, C_out, TP)
    c_out = o_ref.shape[1]
    c_in = x_ref.shape[1]
    x = x_ref[0].astype(jnp.float32)                     # (C_in, TP)
    for co in range(c_out):
        acc = x[0:1, :] * w_ref[co * c_in + 0]
        for ci in range(1, c_in):
            acc = acc + x[ci:ci + 1, :] * w_ref[co * c_in + ci]
        o_ref[0, co:co + 1, :] = (acc + b_ref[co]).astype(o_ref.dtype)


def conv1x1_pallas(x, weight, bias, *, tile_p=2048):
    """nn.Conv2d(C_in, C_out, kernel_size=1) forward.  x: (N, C_in, H, W)."""
    n, c_in, h, w = x.shape
    c_out = weight.shape[0]
    hw = h * w
    tile_p = min(tile_p, _round_up(hw, 128))             # lane-dense tile
    p_pad = _round_up(hw, tile_p)                        # pad once, no assert
    xr = x.reshape(n, c_in, hw)
    if p_pad != hw:
        xr = jnp.pad(xr, ((0, 0), (0, 0), (0, p_pad - hw)))
    w_flat = weight.reshape(c_out * c_in).astype(jnp.float32)
    b = bias.astype(jnp.float32)

    out = pl.pallas_call(
        _conv1x1_kernel,
        out_shape=jax.ShapeDtypeStruct((n, c_out, p_pad), x.dtype),
        grid=(n, p_pad // tile_p),
        in_specs=[
            pl.BlockSpec(memory_space=pltpu.MemorySpace.SMEM),
            pl.BlockSpec(memory_space=pltpu.MemorySpace.SMEM),
            pl.BlockSpec((1, c_in, tile_p), lambda i, j: (i, 0, j)),
        ],
        out_specs=pl.BlockSpec((1, c_out, tile_p), lambda i, j: (i, 0, j)),
        compiler_params=pltpu.CompilerParams(
            dimension_semantics=("parallel", "parallel")),
    )(w_flat, b, xr)
    return out[:, :, :hw].reshape(n, c_out, h, w)


# ---------------------------------------------------------------------------
# Pallas kernel 2: fused 3x3 conv (padding=1) + BatchNorm (folded) + ReLU.
# ---------------------------------------------------------------------------
def _conv3x3_bn_relu_kernel(w_ref, scale_ref, shift_ref, x_ref, o_ref):
    # w_ref:     SMEM (C_out*C_in*9,)  flattened (C_out, C_in, 3, 3)
    # scale_ref: SMEM (C_out,)   shift_ref: SMEM (C_out,)  (BN + conv bias folded)
    # x_ref:     VMEM (1, C_in, H+2, W+2)  (spatially pre-padded)
    # o_ref:     VMEM (1, C_out, H, W)
    c_out, h, w = o_ref.shape[1], o_ref.shape[2], o_ref.shape[3]
    c_in = x_ref.shape[1]
    x = x_ref[0].astype(jnp.float32)                     # (C_in, H+2, W+2)
    accs = [jnp.zeros((h, w), jnp.float32) for _ in range(c_out)]
    for ci in range(c_in):
        for dy in range(3):
            for dx in range(3):
                tap = x[ci, dy:dy + h, dx:dx + w]        # shifted (H, W) window
                for co in range(c_out):
                    wv = w_ref[((co * c_in + ci) * 3 + dy) * 3 + dx]
                    accs[co] = accs[co] + wv * tap
    for co in range(c_out):
        y = accs[co] * scale_ref[co] + shift_ref[co]
        o_ref[0, co, :, :] = jnp.maximum(y, 0.0).astype(o_ref.dtype)


def conv3x3_bn_relu_pallas(x, weight, scale, shift):
    """Fused Conv2d(k=3, pad=1) -> BN(eval, folded) -> ReLU.  x: (N, C_in, H, W)."""
    n, c_in, h, w = x.shape
    c_out = weight.shape[0]
    xp = jnp.pad(x, ((0, 0), (0, 0), (1, 1), (1, 1)))    # pad=1 done once in HBM
    w_flat = weight.reshape(c_out * c_in * 9).astype(jnp.float32)
    # TODO(synk): for large H*W, tile spatially with halo blocks instead of a
    # full-image block per batch element.
    return pl.pallas_call(
        _conv3x3_bn_relu_kernel,
        out_shape=jax.ShapeDtypeStruct((n, c_out, h, w), x.dtype),
        grid=(n,),
        in_specs=[
            pl.BlockSpec(memory_space=pltpu.MemorySpace.SMEM),
            pl.BlockSpec(memory_space=pltpu.MemorySpace.SMEM),
            pl.BlockSpec(memory_space=pltpu.MemorySpace.SMEM),
            pl.BlockSpec((1, c_in, h + 2, w + 2), lambda i: (i, 0, 0, 0)),
        ],
        out_specs=pl.BlockSpec((1, c_out, h, w), lambda i: (i, 0, 0, 0)),
        compiler_params=pltpu.CompilerParams(dimension_semantics=("parallel",)),
    )(w_flat, scale.astype(jnp.float32), shift.astype(jnp.float32), xp)


# ---------------------------------------------------------------------------
# Plain-JAX glue: bicubic x2 upsample (align_corners=True), pad, concat.
# ---------------------------------------------------------------------------
def _bicubic_matrix(in_size, out_size, a=-0.75):
    """Interpolation matrix matching torch bicubic upsample, align_corners=True."""
    scale = 0.0 if out_size == 1 else (in_size - 1) / (out_size - 1)
    dst = np.arange(out_size)
    src = dst * scale
    i0 = np.floor(src).astype(np.int64)
    t = src - i0

    def cubic(d):
        d = np.abs(d)
        return np.where(
            d <= 1.0, (a + 2.0) * d ** 3 - (a + 3.0) * d ** 2 + 1.0,
            np.where(d < 2.0, a * d ** 3 - 5.0 * a * d ** 2 + 8.0 * a * d - 4.0 * a, 0.0))

    mat = np.zeros((out_size, in_size), dtype=np.float64)
    for k in range(-1, 3):
        idx = np.clip(i0 + k, 0, in_size - 1)            # edge clamp (like torch)
        np.add.at(mat, (dst, idx), cubic(t - k))
    return jnp.asarray(mat.astype(np.float32))


def _bicubic_upsample_x2(x):
    n, c, h, w = x.shape
    uh = _bicubic_matrix(h, 2 * h)
    uw = _bicubic_matrix(w, 2 * w)
    y = jnp.einsum("nchw,yh->ncyw", x, uh, precision=lax.Precision.HIGHEST)
    y = jnp.einsum("ncyw,xw->ncyx", y, uw, precision=lax.Precision.HIGHEST)
    return y


# ---------------------------------------------------------------------------
# Up.forward
# ---------------------------------------------------------------------------
def up_forward(x1, x2, p, eps=1e-5):
    # 1) Upsample(scale_factor=2, mode='bicubic', align_corners=True)    [glue]
    x1u = _bicubic_upsample_x2(x1)
    # 2) reduce: 1x1 conv                                              [Pallas]
    x1r = conv1x1_pallas(x1u, p["reduce_w"], p["reduce_b"])
    # 3) F.pad to match x2 spatial size                                  [glue]
    dy = x2.shape[2] - x1r.shape[2]
    dx = x2.shape[3] - x1r.shape[3]
    x1p = jnp.pad(x1r, ((0, 0), (0, 0),
                        (dy // 2, dy - dy // 2), (dx // 2, dx - dx // 2)))
    # 4) concat along channels                                           [glue]
    xc = jnp.concatenate([x2, x1p], axis=1)
    # 5) DoubleConv: (3x3 conv -> BN -> ReLU) x 2                      [Pallas]
    s1 = p["bn1_gamma"] / jnp.sqrt(p["bn1_var"] + eps)
    t1 = (p["conv1_b"] - p["bn1_mean"]) * s1 + p["bn1_beta"]
    y = conv3x3_bn_relu_pallas(xc, p["conv1_w"], s1, t1)
    s2 = p["bn2_gamma"] / jnp.sqrt(p["bn2_var"] + eps)
    t2 = (p["conv2_b"] - p["bn2_mean"]) * s2 + p["bn2_beta"]
    y = conv3x3_bn_relu_pallas(y, p["conv2_w"], s2, t2)
    return y


# Pure-JAX reference (high precision) for checking the Pallas kernels.
def _ref_forward(x1, x2, p, eps=1e-5):
    x1u = _bicubic_upsample_x2(x1)
    c_out, c_in = p["reduce_w"].shape[0], p["reduce_w"].shape[1]
    r = jnp.einsum("nchw,oc->nohw", x1u, p["reduce_w"].reshape(c_out, c_in),
                   precision=lax.Precision.HIGHEST) + p["reduce_b"][None, :, None, None]
    dy = x2.shape[2] - r.shape[2]
    dx = x2.shape[3] - r.shape[3]
    r = jnp.pad(r, ((0, 0), (0, 0), (dy // 2, dy - dy // 2), (dx // 2, dx - dx // 2)))
    xc = jnp.concatenate([x2, r], axis=1)

    def conv_bn_relu(xv, wv, bv, g, bt, m, v):
        y = lax.conv_general_dilated(
            xv, wv, window_strides=(1, 1), padding=((1, 1), (1, 1)),
            dimension_numbers=("NCHW", "OIHW", "NCHW"),
            precision=lax.Precision.HIGHEST)
        y = y + bv[None, :, None, None]
        s = g / jnp.sqrt(v + eps)
        y = (y - m[None, :, None, None]) * s[None, :, None, None] + bt[None, :, None, None]
        return jnp.maximum(y, 0.0)

    y = conv_bn_relu(xc, p["conv1_w"], p["conv1_b"],
                     p["bn1_gamma"], p["bn1_beta"], p["bn1_mean"], p["bn1_var"])
    y = conv_bn_relu(y, p["conv2_w"], p["conv2_b"],
                     p["bn2_gamma"], p["bn2_beta"], p["bn2_mean"], p["bn2_var"])
    return y


if __name__ == "__main__":
    # Up(x1_channels=8, x2_channels=4, out_channels=4), small deterministic shapes.
    x1_ch, x2_ch, out_ch = 8, 4, 4
    n, h1, w1 = 2, 8, 8
    h2, w2 = 2 * h1, 2 * w1

    keys = jax.random.split(jax.random.PRNGKey(0), 18)
    x1 = jax.random.normal(keys[0], (n, x1_ch, h1, w1), jnp.float32)
    x2 = jax.random.normal(keys[1], (n, x2_ch, h2, w2), jnp.float32)

    p = {
        "reduce_w": jax.random.normal(keys[2], (out_ch, x1_ch, 1, 1), jnp.float32) * 0.1,
        "reduce_b": jax.random.normal(keys[3], (out_ch,), jnp.float32) * 0.1,
        "conv1_w": jax.random.normal(keys[4], (out_ch, out_ch + x2_ch, 3, 3), jnp.float32) * 0.1,
        "conv1_b": jax.random.normal(keys[5], (out_ch,), jnp.float32) * 0.1,
        "bn1_gamma": 1.0 + 0.1 * jax.random.normal(keys[6], (out_ch,), jnp.float32),
        "bn1_beta": 0.1 * jax.random.normal(keys[7], (out_ch,), jnp.float32),
        "bn1_mean": 0.1 * jax.random.normal(keys[8], (out_ch,), jnp.float32),
        "bn1_var": jax.random.uniform(keys[9], (out_ch,), jnp.float32, 0.5, 1.5),
        "conv2_w": jax.random.normal(keys[10], (out_ch, out_ch, 3, 3), jnp.float32) * 0.1,
        "conv2_b": jax.random.normal(keys[11], (out_ch,), jnp.float32) * 0.1,
        "bn2_gamma": 1.0 + 0.1 * jax.random.normal(keys[12], (out_ch,), jnp.float32),
        "bn2_beta": 0.1 * jax.random.normal(keys[13], (out_ch,), jnp.float32),
        "bn2_mean": 0.1 * jax.random.normal(keys[14], (out_ch,), jnp.float32),
        "bn2_var": jax.random.uniform(keys[15], (out_ch,), jnp.float32, 0.5, 1.5),
    }

    out = up_forward(x1, x2, p)
    out = jax.block_until_ready(out)

    ref = _ref_forward(x1, x2, p)
    assert out.shape == (n, out_ch, h2, w2), out.shape
    assert jnp.allclose(out, ref, atol=1e-4, rtol=1e-4), \
        float(jnp.max(jnp.abs(out - ref)))

    print("KERNEL_OK")
</pallas_src>

<mosaic_0001>
module attributes {stable_mosaic.version = 11 : i64} {
  func.func @_conv1x1_kernel(%arg0: i32, %arg1: i32, %arg2: memref<32xf32, #tpu.memory_space<smem>>, %arg3: memref<4xf32, #tpu.memory_space<smem>>, %arg4: memref<1x8x256xf32, #tpu.memory_space<vmem>>, %arg5: memref<1x4x256xf32, #tpu.memory_space<vmem>>) attributes {dimension_semantics = [#tpu.dimension_semantics<parallel>, #tpu.dimension_semantics<parallel>], iteration_bounds = array<i64: 2, 1>, scalar_prefetch = 0 : i64, scratch_operands = 0 : i64, tpu.core_type = #tpu.core_type<tc>, window_params = [{transform_indices = @transform_0, window_bounds = array<i64: 32>}, {transform_indices = @transform_1, window_bounds = array<i64: 4>}, {transform_indices = @transform_2, window_bounds = array<i64: 1, 8, 256>}, {transform_indices = @transform_3, window_bounds = array<i64: 1, 4, 256>}]} {
    %c0 = arith.constant 0 : index
    %c0_0 = arith.constant 0 : index
    %c0_1 = arith.constant 0 : index
    %0 = vector.load %arg4[%c0, %c0_0, %c0_1] : memref<1x8x256xf32, #tpu.memory_space<vmem>>, vector<1x8x256xf32>
    %1 = vector.shape_cast %0 : vector<1x8x256xf32> to vector<8x256xf32>
    %2 = vector.extract_strided_slice %1 {offsets = [0, 0], sizes = [1, 256], strides = [1, 1]} : vector<8x256xf32> to vector<1x256xf32>
    %c0_2 = arith.constant 0 : index
    %3 = memref.load %arg2[%c0_2] : memref<32xf32, #tpu.memory_space<smem>>
    %4 = vector.broadcast %3 : f32 to vector<1x256xf32>
    %5 = arith.mulf %2, %4 : vector<1x256xf32>
    %6 = vector.extract_strided_slice %1 {offsets = [1, 0], sizes = [1, 256], strides = [1, 1]} : vector<8x256xf32> to vector<1x256xf32>
    %c1 = arith.constant 1 : index
    %7 = memref.load %arg2[%c1] : memref<32xf32, #tpu.memory_space<smem>>
    %8 = vector.broadcast %7 : f32 to vector<1x256xf32>
    %9 = arith.mulf %6, %8 : vector<1x256xf32>
    %10 = arith.addf %5, %9 : vector<1x256xf32>
    %11 = vector.extract_strided_slice %1 {offsets = [2, 0], sizes = [1, 256], strides = [1, 1]} : vector<8x256xf32> to vector<1x256xf32>
    %c2 = arith.constant 2 : index
    %12 = memref.load %arg2[%c2] : memref<32xf32, #tpu.memory_space<smem>>
    %13 = vector.broadcast %12 : f32 to vector<1x256xf32>
    %14 = arith.mulf %11, %13 : vector<1x256xf32>
    %15 = arith.addf %10, %14 : vector<1x256xf32>
    %16 = vector.extract_strided_slice %1 {offsets = [3, 0], sizes = [1, 256], strides = [1, 1]} : vector<8x256xf32> to vector<1x256xf32>
    %c3 = arith.constant 3 : index
    %17 = memref.load %arg2[%c3] : memref<32xf32, #tpu.memory_space<smem>>
    %18 = vector.broadcast %17 : f32 to vector<1x256xf32>
    %19 = arith.mulf %16, %18 : vector<1x256xf32>
    %20 = arith.addf %15, %19 : vector<1x256xf32>
    %21 = vector.extract_strided_slice %1 {offsets = [4, 0], sizes = [1, 256], strides = [1, 1]} : vector<8x256xf32> to vector<1x256xf32>
    %c4 = arith.constant 4 : index
    %22 = memref.load %arg2[%c4] : memref<32xf32, #tpu.memory_space<smem>>
    %23 = vector.broadcast %22 : f32 to vector<1x256xf32>
    %24 = arith.mulf %21, %23 : vector<1x256xf32>
    %25 = arith.addf %20, %24 : vector<1x256xf32>
    %26 = vector.extract_strided_slice %1 {offsets = [5, 0], sizes = [1, 256], strides = [1, 1]} : vector<8x256xf32> to vector<1x256xf32>
    %c5 = arith.constant 5 : index
    %27 = memref.load %arg2[%c5] : memref<32xf32, #tpu.memory_space<smem>>
    %28 = vector.broadcast %27 : f32 to vector<1x256xf32>
    %29 = arith.mulf %26, %28 : vector<1x256xf32>
    %30 = arith.addf %25, %29 : vector<1x256xf32>
    %31 = vector.extract_strided_slice %1 {offsets = [6, 0], sizes = [1, 256], strides = [1, 1]} : vector<8x256xf32> to vector<1x256xf32>
    %c6 = arith.constant 6 : index
    %32 = memref.load %arg2[%c6] : memref<32xf32, #tpu.memory_space<smem>>
    %33 = vector.broadcast %32 : f32 to vector<1x256xf32>
    %34 = arith.mulf %31, %33 : vector<1x256xf32>
    %35 = arith.addf %30, %34 : vector<1x256xf32>
    %36 = vector.extract_strided_slice %1 {offsets = [7, 0], sizes = [1, 256], strides = [1, 1]} : vector<8x256xf32> to vector<1x256xf32>
    %c7 = arith.constant 7 : index
    %37 = memref.load %arg2[%c7] : memref<32xf32, #tpu.memory_space<smem>>
    %38 = vector.broadcast %37 : f32 to vector<1x256xf32>
    %39 = arith.mulf %36, %38 : vector<1x256xf32>
    %40 = arith.addf %35, %39 : vector<1x256xf32>
    %c0_3 = arith.constant 0 : index
    %41 = memref.load %arg3[%c0_3] : memref<4xf32, #tpu.memory_space<smem>>
    %42 = vector.broadcast %41 : f32 to vector<1x256xf32>
    %43 = arith.addf %40, %42 : vector<1x256xf32>
    %c0_4 = arith.constant 0 : index
    %c0_5 = arith.constant 0 : index
    %c0_6 = arith.constant 0 : index
    %44 = vector.load %arg5[%c0_4, %c0_5, %c0_6] : memref<1x4x256xf32, #tpu.memory_space<vmem>>, vector<1x1x256xf32>
    %45 = vector.shape_cast %44 : vector<1x1x256xf32> to vector<1x256xf32>
    %46 = vector.shape_cast %43 : vector<1x256xf32> to vector<1x1x256xf32>
    tpu.vector_store %arg5[%c0_4, %c0_5, %c0_6], %46 {strides = array<i32>} : memref<1x4x256xf32, #tpu.memory_space<vmem>>, vector<1x1x256xf32>,
    %47 = vector.extract_strided_slice %1 {offsets = [0, 0], sizes = [1, 256], strides = [1, 1]} : vector<8x256xf32> to vector<1x256xf32>
    %c8 = arith.constant 8 : index
    %48 = memref.load %arg2[%c8] : memref<32xf32, #tpu.memory_space<smem>>
    %49 = vector.broadcast %48 : f32 to vector<1x256xf32>
    %50 = arith.mulf %47, %49 : vector<1x256xf32>
    %51 = vector.extract_strided_slice %1 {offsets = [1, 0], sizes = [1, 256], strides = [1, 1]} : vector<8x256xf32> to vector<1x256xf32>
    %c9 = arith.constant 9 : index
    %52 = memref.load %arg2[%c9] : memref<32xf32, #tpu.memory_space<smem>>
    %53 = vector.broadcast %52 : f32 to vector<1x256xf32>
    %54 = arith.mulf %51, %53 : vector<1x256xf32>
    %55 = arith.addf %50, %54 : vector<1x256xf32>
    %56 = vector.extract_strided_slice %1 {offsets = [2, 0], sizes = [1, 256], strides = [1, 1]} : vector<8x256xf32> to vector<1x256xf32>
    %c10 = arith.constant 10 : index
    %57 = memref.load %arg2[%c10] : memref<32xf32, #tpu.memory_space<smem>>
    %58 = vector.broadcast %57 : f32 to vector<1x256xf32>
    %59 = arith.mulf %56, %58 : vector<1x256xf32>
    %60 = arith.addf %55, %59 : vector<1x256xf32>
    %61 = vector.extract_strided_slice %1 {offsets = [3, 0], sizes = [1, 256], strides = [1, 1]} : vector<8x256xf32> to vector<1x256xf32>
    %c11 = arith.constant 11 : index
    %62 = memref.load %arg2[%c11] : memref<32xf32, #tpu.memory_space<smem>>
    %63 = vector.broadcast %62 : f32 to vector<1x256xf32>
    %64 = arith.mulf %61, %63 : vector<1x256xf32>
    %65 = arith.addf %60, %64 : vector<1x256xf32>
    %66 = vector.extract_strided_slice %1 {offsets = [4, 0], sizes = [1, 256], strides = [1, 1]} : vector<8x256xf32> to vector<1x256xf32>
    %c12 = arith.constant 12 : index
    %67 = memref.load %arg2[%c12] : memref<32xf32, #tpu.memory_space<smem>>
    %68 = vector.broadcast %67 : f32 to vector<1x256xf32>
    %69 = arith.mulf %66, %68 : vector<1x256xf32>
    %70 = arith.addf %65, %69 : vector<1x256xf32>
    %71 = vector.extract_strided_slice %1 {offsets = [5, 0], sizes = [1, 256], strides = [1, 1]} : vector<8x256xf32> to vector<1x256xf32>
    %c13 = arith.constant 13 : index
    %72 = memref.load %arg2[%c13] : memref<32xf32, #tpu.memory_space<smem>>
    %73 = vector.broadcast %72 : f32 to vector<1x256xf32>
    %74 = arith.mulf %71, %73 : vector<1x256xf32>
    %75 = arith.addf %70, %74 : vector<1x256xf32>
    %76 = vector.extract_strided_slice %1 {offsets = [6, 0], sizes = [1, 256], strides = [1, 1]} : vector<8x256xf32> to vector<1x256xf32>
    %c14 = arith.constant 14 : index
    %77 = memref.load %arg2[%c14] : memref<32xf32, #tpu.memory_space<smem>>
    %78 = vector.broadcast %77 : f32 to vector<1x256xf32>
    %79 = arith.mulf %76, %78 : vector<1x256xf32>
    %80 = arith.addf %75, %79 : vector<1x256xf32>
    %81 = vector.extract_strided_slice %1 {offsets = [7, 0], sizes = [1, 256], strides = [1, 1]} : vector<8x256xf32> to vector<1x256xf32>
    %c15 = arith.constant 15 : index
    %82 = memref.load %arg2[%c15] : memref<32xf32, #tpu.memory_space<smem>>
    %83 = vector.broadcast %82 : f32 to vector<1x256xf32>
    %84 = arith.mulf %81, %83 : vector<1x256xf32>
    %85 = arith.addf %80, %84 : vector<1x256xf32>
    %c1_7 = arith.constant 1 : index
    %86 = memref.load %arg3[%c1_7] : memref<4xf32, #tpu.memory_space<smem>>
    %87 = vector.broadcast %86 : f32 to vector<1x256xf32>
    %88 = arith.addf %85, %87 : vector<1x256xf32>
    %c0_8 = arith.constant 0 : index
    %c1_9 = arith.constant 1 : index
    %c0_10 = arith.constant 0 : index
    %89 = vector.load %arg5[%c0_8, %c1_9, %c0_10] : memref<1x4x256xf32, #tpu.memory_space<vmem>>, vector<1x1x256xf32>
    %90 = vector.shape_cast %89 : vector<1x1x256xf32> to vector<1x256xf32>
    %91 = vector.shape_cast %88 : vector<1x256xf32> to vector<1x1x256xf32>
    tpu.vector_store %arg5[%c0_8, %c1_9, %c0_10], %91 {strides = array<i32>} : memref<1x4x256xf32, #tpu.memory_space<vmem>>, vector<1x1x256xf32>,
    %92 = vector.extract_strided_slice %1 {offsets = [0, 0], sizes = [1, 256], strides = [1, 1]} : vector<8x256xf32> to vector<1x256xf32>
    %c16 = arith.constant 16 : index
    %93 = memref.load %arg2[%c16] : memref<32xf32, #tpu.memory_space<smem>>
    %94 = vector.broadcast %93 : f32 to vector<1x256xf32>
    %95 = arith.mulf %92, %94 : vector<1x256xf32>
    %96 = vector.extract_strided_slice %1 {offsets = [1, 0], sizes = [1, 256], strides = [1, 1]} : vector<8x256xf32> to vector<1x256xf32>
    %c17 = arith.constant 17 : index
    %97 = memref.load %arg2[%c17] : memref<32xf32, #tpu.memory_space<smem>>
    %98 = vector.broadcast %97 : f32 to vector<1x256xf32>
    %99 = arith.mulf %96, %98 : vector<1x256xf32>
    %100 = arith.addf %95, %99 : vector<1x256xf32>
    %101 = vector.extract_strided_slice %1 {offsets = [2, 0], sizes = [1, 256], strides = [1, 1]} : vector<8x256xf32> to vector<1x256xf32>
    %c18 = arith.constant 18 : index
    %102 = memref.load %arg2[%c18] : memref<32xf32, #tpu.memory_space<smem>>
    %103 = vector.broadcast %102 : f32 to vector<1x256xf32>
    %104 = arith.mulf %101, %103 : vector<1x256xf32>
    %105 = arith.addf %100, %104 : vector<1x256xf32>
    %106 = vector.extract_strided_slice %1 {offsets = [3, 0], sizes = [1, 256], strides = [1, 1]} : vector<8x256xf32> to vector<1x256xf32>
    %c19 = arith.constant 19 : index
    %107 = memref.load %arg2[%c19] : memref<32xf32, #tpu.memory_space<smem>>
    %108 = vector.broadcast %107 : f32 to vector<1x256xf32>
    %109 = arith.mulf %106, %108 : vector<1x256xf32>
    %110 = arith.addf %105, %109 : vector<1x256xf32>
    %111 = vector.extract_strided_slice %1 {offsets = [4, 0], sizes = [1, 256], strides = [1, 1]} : vector<8x256xf32> to vector<1x256xf32>
    %c20 = arith.constant 20 : index
    %112 = memref.load %arg2[%c20] : memref<32xf32, #tpu.memory_space<smem>>
    %113 = vector.broadcast %112 : f32 to vector<1x256xf32>
    %114 = arith.mulf %111, %113 : vector<1x256xf32>
    %115 = arith.addf %110, %114 : vector<1x256xf32>
    %116 = vector.extract_strided_slice %1 {offsets = [5, 0], sizes = [1, 256], strides = [1, 1]} : vector<8x256xf32> to vector<1x256xf32>
    %c21 = arith.constant 21 : index
    %117 = memref.load %arg2[%c21] : memref<32xf32, #tpu.memory_space<smem>>
    %118 = vector.broadcast %117 : f32 to vector<1x256xf32>
    %119 = arith.mulf %116, %118 : vector<1x256xf32>
    %120 = arith.addf %115, %119 : vector<1x256xf32>
    %121 = vector.extract_strided_slice %1 {offsets = [6, 0], sizes = [1, 256], strides = [1, 1]} : vector<8x256xf32> to vector<1x256xf32>
    %c22 = arith.constant 22 : index
    %122 = memref.load %arg2[%c22] : memref<32xf32, #tpu.memory_space<smem>>
    %123 = vector.broadcast %122 : f32 to vector<1x256xf32>
    %124 = arith.mulf %121, %123 : vector<1x256xf32>
    %125 = arith.addf %120, %124 : vector<1x256xf32>
    %126 = vector.extract_strided_slice %1 {offsets = [7, 0], sizes = [1, 256], strides = [1, 1]} : vector<8x256xf32> to vector<1x256xf32>
    %c23 = arith.constant 23 : index
    %127 = memref.load %arg2[%c23] : memref<32xf32, #tpu.memory_space<smem>>
    %128 = vector.broadcast %127 : f32 to vector<1x256xf32>
    %129 = arith.mulf %126, %128 : vector<1x256xf32>
    %130 = arith.addf %125, %129 : vector<1x256xf32>
    %c2_11 = arith.constant 2 : index
    %131 = memref.load %arg3[%c2_11] : memref<4xf32, #tpu.memory_space<smem>>
    %132 = vector.broadcast %131 : f32 to vector<1x256xf32>
    %133 = arith.addf %130, %132 : vector<1x256xf32>
    %c0_12 = arith.constant 0 : index
    %c2_13 = arith.constant 2 : index
    %c0_14 = arith.constant 0 : index
    %134 = vector.load %arg5[%c0_12, %c2_13, %c0_14] : memref<1x4x256xf32, #tpu.memory_space<vmem>>, vector<1x1x256xf32>
    %135 = vector.shape_cast %134 : vector<1x1x256xf32> to vector<1x256xf32>
    %136 = vector.shape_cast %133 : vector<1x256xf32> to vector<1x1x256xf32>
    tpu.vector_store %arg5[%c0_12, %c2_13, %c0_14], %136 {strides = array<i32>} : memref<1x4x256xf32, #tpu.memory_space<vmem>>, vector<1x1x256xf32>,
    %137 = vector.extract_strided_slice %1 {offsets = [0, 0], sizes = [1, 256], strides = [1, 1]} : vector<8x256xf32> to vector<1x256xf32>
    %c24 = arith.constant 24 : index
    %138 = memref.load %arg2[%c24] : memref<32xf32, #tpu.memory_space<smem>>
    %139 = vector.broadcast %138 : f32 to vector<1x256xf32>
    %140 = arith.mulf %137, %139 : vector<1x256xf32>
    %141 = vector.extract_strided_slice %1 {offsets = [1, 0], sizes = [1, 256], strides = [1, 1]} : vector<8x256xf32> to vector<1x256xf32>
    %c25 = arith.constant 25 : index
    %142 = memref.load %arg2[%c25] : memref<32xf32, #tpu.memory_space<smem>>
    %143 = vector.broadcast %142 : f32 to vector<1x256xf32>
    %144 = arith.mulf %141, %143 : vector<1x256xf32>
    %145 = arith.addf %140, %144 : vector<1x256xf32>
    %146 = vector.extract_strided_slice %1 {offsets = [2, 0], sizes = [1, 256], strides = [1, 1]} : vector<8x256xf32> to vector<1x256xf32>
    %c26 = arith.constant 26 : index
    %147 = memref.load %arg2[%c26] : memref<32xf32, #tpu.memory_space<smem>>
    %148 = vector.broadcast %147 : f32 to vector<1x256xf32>
    %149 = arith.mulf %146, %148 : vector<1x256xf32>
    %150 = arith.addf %145, %149 : vector<1x256xf32>
    %151 = vector.extract_strided_slice %1 {offsets = [3, 0], sizes = [1, 256], strides = [1, 1]} : vector<8x256xf32> to vector<1x256xf32>
    %c27 = arith.constant 27 : index
    %152 = memref.load %arg2[%c27] : memref<32xf32, #tpu.memory_space<smem>>
    %153 = vector.broadcast %152 : f32 to vector<1x256xf32>
    %154 = arith.mulf %151, %153 : vector<1x256xf32>
    %155 = arith.addf %150, %154 : vector<1x256xf32>
    %156 = vector.extract_strided_slice %1 {offsets = [4, 0], sizes = [1, 256], strides = [1, 1]} : vector<8x256xf32> to vector<1x256xf32>
    %c28 = arith.constant 28 : index
    %157 = memref.load %arg2[%c28] : memref<32xf32, #tpu.memory_space<smem>>
    %158 = vector.broadcast %157 : f32 to vector<1x256xf32>
    %159 = arith.mulf %156, %158 : vector<1x256xf32>
    %160 = arith.addf %155, %159 : vector<1x256xf32>
    %161 = vector.extract_strided_slice %1 {offsets = [5, 0], sizes = [1, 256], strides = [1, 1]} : vector<8x256xf32> to vector<1x256xf32>
    %c29 = arith.constant 29 : index
    %162 = memref.load %arg2[%c29] : memref<32xf32, #tpu.memory_space<smem>>
    %163 = vector.broadcast %162 : f32 to vector<1x256xf32>
    %164 = arith.mulf %161, %163 : vector<1x256xf32>
    %165 = arith.addf %160, %164 : vector<1x256xf32>
    %166 = vector.extract_strided_slice %1 {offsets = [6, 0], sizes = [1, 256], strides = [1, 1]} : vector<8x256xf32> to vector<1x256xf32>
    %c30 = arith.constant 30 : index
    %167 = memref.load %arg2[%c30] : memref<32xf32, #tpu.memory_space<smem>>
    %168 = vector.broadcast %167 : f32 to vector<1x256xf32>
    %169 = arith.mulf %166, %168 : vector<1x256xf32>
    %170 = arith.addf %165, %169 : vector<1x256xf32>
    %171 = vector.extract_strided_slice %1 {offsets = [7, 0], sizes = [1, 256], strides = [1, 1]} : vector<8x256xf32> to vector<1x256xf32>
    %c31 = arith.constant 31 : index
    %172 = memref.load %arg2[%c31] : memref<32xf32, #tpu.memory_space<smem>>
    %173 = vector.broadcast %172 : f32 to vector<1x256xf32>
    %174 = arith.mulf %171, %173 : vector<1x256xf32>
    %175 = arith.addf %170, %174 : vector<1x256xf32>
    %c3_15 = arith.constant 3 : index
    %176 = memref.load %arg3[%c3_15] : memref<4xf32, #tpu.memory_space<smem>>
    %177 = vector.broadcast %176 : f32 to vector<1x256xf32>
    %178 = arith.addf %175, %177 : vector<1x256xf32>
    %c0_16 = arith.constant 0 : index
    %c3_17 = arith.constant 3 : index
    %c0_18 = arith.constant 0 : index
    %179 = vector.load %arg5[%c0_16, %c3_17, %c0_18] : memref<1x4x256xf32, #tpu.memory_space<vmem>>, vector<1x1x256xf32>
    %180 = vector.shape_cast %179 : vector<1x1x256xf32> to vector<1x256xf32>
    %181 = vector.shape_cast %178 : vector<1x256xf32> to vector<1x1x256xf32>
    tpu.vector_store %arg5[%c0_16, %c3_17, %c0_18], %181 {strides = array<i32>} : memref<1x4x256xf32, #tpu.memory_space<vmem>>, vector<1x1x256xf32>,
    return
  }
  func.func @transform_0(%arg0: i32, %arg1: i32) -> i32 {
    %c0_i32 = arith.constant 0 : i32
    %c0_i32_0 = arith.constant 0 : i32
    return %c0_i32 : i32
  }
  func.func @transform_1(%arg0: i32, %arg1: i32) -> i32 {
    %c0_i32 = arith.constant 0 : i32
    %c0_i32_0 = arith.constant 0 : i32
    return %c0_i32 : i32
  }
  func.func @transform_2(%arg0: i32, %arg1: i32) -> (i32, i32, i32) {
    %c0_i32 = arith.constant 0 : i32
    %c0_i32_0 = arith.constant 0 : i32
    return %arg0, %c0_i32, %arg1 : i32, i32, i32
  }
  func.func @transform_3(%arg0: i32, %arg1: i32) -> (i32, i32, i32) {
    %c0_i32 = arith.constant 0 : i32
    %c0_i32_0 = arith.constant 0 : i32
    return %arg0, %c0_i32, %arg1 : i32, i32, i32
  }
}

</mosaic_0001>

<bundles_post_ra>
// kernel: tpu_custom_call.1
= control target key start
LH: loop header
LB: loop body
LE: loop exit
PB: predicated region body
PF: predicated region fallthrough
CT: control target
= control target key end

     0   :  { %8 = vsyncpa [#allocation5], 0  ;;  %s1409_s0 = inlined_call_operand.hbm [shape: f32[32], index: 0, kind: input, shape index: {}]   ;;  %s1410_s1 = inlined_call_operand.hbm [shape: f32[4], index: 1, kind: input, shape index: {}]   ;;  %s1411_s2 = inlined_call_operand.hbm [shape: f32[2,8,256], index: 2, kind: input, shape index: {}]   ;;  %s1412_s3 = inlined_call_operand.hbm [shape: f32[2,4,256], index: 3, kind: output, shape index: {}]  }
   0x1   :  { %9 = vsyncpa [#allocation7], 0 }
   0x2   :  { %10 = vsyncpa [#allocation3], 0 }
   0x3   :  { %12 = vsyncpa [#allocation3 + $0x1], 0 }
   0x4   :  { %13 = vsyncpa [#allocation4], 0 }
   0x5   :  { %15 = vsyncpa [#allocation4 + $0x1], 0  ;;  %s1078_s12 = smov 0   ;;  %s1080_s13 = smov 0  }
   0x6   :  { %s1082_s14 = smov 0   ;;  %s1084_s15 = smov 0  }
   0x7   :  { %s1086_s16 = smov 0   ;;  %s1088_s17 = smov 0  }
   0x8 LB: > { %s763_s18 = sadd.s32 4294967295, %s1054_s17   ;;  %s764_s19 = sadd.s32 4294967294, %s1054_s17   ;;  %s1054_s17 = sphi %s1088_s17, %s21_s17   ;;  %s1050_s16 = sphi %s1086_s16, %s1424_s16   ;;  %s1046_s15 = sphi %s1084_s15, %s1423_s15   ;;  %s1042_s14 = sphi %s1082_s14, %s1422_s14   ;;  %s1038_s13 = sphi %s1080_s13, %s1421_s13   ;;  %s1034_s12 = sphi %s1078_s12, %s1420_s12  }
   0x9   : > { %p97_p0 = scmp.ne.s32.totalorder %s1038_s13, %s1034_s12  ;;  %p1112_p1 = scmp.eq.s32.totalorder %s763_s18, 0 }
   0xa   : > { %p129_p2 = scmp.eq.s32.totalorder %s764_s19, 1  ;;  %p765_p4 = scmp.ge.s32.totalorder %s1054_s17, 1 }
   0xb   : > { %p1118_p3 = por %p1112_p1, %p97_p0  ;;  %p136_p6 = scmp.lt.s32.totalorder %s1054_s17, 3 }
   0xc   : > { %p1123_p5 = por %p129_p2, %p97_p0  ;;  %s148_s25 = sshll.u32 %s1409_s0, 4  ;;  %s149_s25 = int_to_ptr.hbm [resolvable:$true] %s148_s25 }
   0xd   : > { %p1131_p7 = pnand %p765_p4, %p136_p6  ;;  %p768_p8 = scmp.ge.s32.totalorder %s1054_s17, 2 }
   0xe   : > { %s158_s29 = sshll.u32 %s1410_s1, 4  ;;  %s1056_s30 = smov [#allocation2]   ;;  %s159_s29 = int_to_ptr.hbm [resolvable:$true] %s158_s29 }
   0xf   : > { %p833_p9 = pneg %p1131_p7  ;;  %s1057_s4 = smov [#allocation6]  }
  0x10   : > { %p123_p11 = scmp.eq.s32.totalorder %s763_s18, 1  ;;  %s33_s5 = sadd.s32 1, %s1050_s16 }
  0x11   : > { %p834_p10 = pnand %p833_p9, %p1112_p1  ;;  %p35_p12 = scmp.ge.s32.totalorder %s33_s5, 2 }
  0x12   : > { %s84_s6 = sadd.s32 1, %s1042_s14  ;;  %p91_p13 = scmp.ne.s32.totalorder %s1042_s14, %s1038_s13 }
  0x13   : > { %836 = dma.hbm_to_smem (!%p834_p10), %s149_s25, 16, %s1056_s30, [#allocation5]  }
  0x14   : > { %839 = dma.hbm_to_smem (!%p834_p10), %s159_s29, 16, %s1057_s4, [#allocation7]  }
  0x15   : > { %p92_p0 = scmp.eq.s32.totalorder %s1054_s17, 0  ;;  %s1426_s5 = smov (%p35_p12, %s33_s5), 0 }
  0x16   : > { %p1150_p2 = por %p123_p11, %p91_p13  ;;  %p850_p4 = scmp.lt.s32.totalorder %s1054_s17, 2 }
  0x17   : > { %s79_s8 = ssub.s32 %s1050_s16, %s1426_s5  ;;  %s169_s9 = sand.u32 1, %s1042_s14  }
  0x18   : > { %p82_p6 = scmp.eq.s32.totalorder %s79_s8, 0  ;;  %p93_p9 = por %p92_p0, %p91_p13 }
  0x19   : > { %s769_s10 = sshll.u32 %s169_s9, 4  ;;  %s819_s11 = sshll.u32 %s1050_s16, 4 }
  0x1a   : > { %s1160_s18 = scalar_select %p82_p6, %s1042_s14, %s84_s6  }
  0x1b   : > { %s180_s24 = scalar_lea.hbm %s1411_s2, %s819_s11  ;;  %s173_s27 = scalar_lea.vmem [#allocation8], %s769_s10 }
  0x1c   : > { %s182_s25 = sshll.u32 %s180_s24, 4  ;;  %s184_s28 = sshll.u32 %s173_s27, 4  ;;  %s183_s25 = int_to_ptr.hbm [resolvable:$true] %s182_s25  ;;  %s185_s28 = int_to_ptr.vmem [resolvable:$true] %s184_s28 }
  0x1d   : > { %p841_p10 = pnand %p850_p4, %p93_p9  ;;  %s170_s29 = scalar_lea.sflag [#allocation3], %s169_s9 }
  0x1e   : > { %193 = sbr.rel (%p1131_p7) target bundleno = 120 (0x78), region = 32 }
  0x1f   : > { %843 = dma.hbm_to_vmem [thread:$0]  (!%p841_p10), %s183_s25, 256, %s185_s28, %s170_s29  }
  0x23   : > { %1017 = dma.done.wait (%p1112_p1), [#allocation5], 16  }
  0x24   : > { %1019 = vsyncadd (%p1112_p1), [#allocation5], 4294967280 }
  0x25   : > { %1021 = dma.done.wait (%p1112_p1), [#allocation7], 16  }
  0x26   : > { %1023 = vsyncadd (%p1112_p1), [#allocation7], 4294967280  ;;  %s1178_s30 = sand.u32 1, %s1038_s13  }
  0x27   : > { %s775_s26 = sshll.u32 %s1178_s30, 4  ;;  %s206_s4 = scalar_lea.sflag [#allocation3], %s1178_s30 }
  0x28   : > { %s209_s6 = scalar_lea.vmem [#allocation8], %s775_s26 }
  0x29   : > { %1025 = dma.done.wait (%p1118_p3), %s206_s4, 256  }
  0x2a   : > { %1027 = vsyncadd (%p1118_p3), %s206_s4, 4294967040 }
  0x2b   : > { %215 = sfence }
  0x2c   : > { %s238_s8 = sld [smem:[#allocation2]]  ;;  %v1188_v0 = vld [vmem:[%s209_s6] sm:$0xff]  ;;  %v1190_v1 = vld [vmem:[%s209_s6 + $0x8] sm:$0xff]  ;;  %v336_v12 = vlaneseq  ;;  %vm333_vm0 = vcmask 1040384  }
  0x2d   : > { %s777_s9 = sld [smem:[#allocation2 + $0x1]] }
  0x2e   : > { %s778_s10 = sld [smem:[#allocation2 + $0x2]]  ;;  %vm1238_vm1 = vcmp.lt.s32.totalorder %v336_v12, 256 }
  0x2f   : > { %s779_s20 = sld [smem:[#allocation2 + $0x3]] }
  0x30   : > { %s1186_s11 = sld [smem:[#allocation2 + $0x4]] }
  0x31   : > { %s1192_s19 = sld [smem:[#allocation2 + $0x5]] }
  0x32   : > { %v239_v2 = vstv %s238_s8  ;;  %s1194_s23 = sld [smem:[#allocation2 + $0x6]] }
  0x33   : > { %v240_v3 = vmul.f32 %v239_v2, %v1188_v0  ;;  %v243_v4 = vstv %s777_s9  ;;  %s1197_s21 = sld [smem:[#allocation2 + $0x7]]  ;;  %v241_v5 = vmul.f32 %v239_v2, %v1190_v1 }
  0x34   : > { %v244_v6 = vmul.f32 %v243_v4, %v1188_v0  ;;  %v245_v7 = vmul.f32 %v243_v4, %v1190_v1  ;;  %v255_v8 = vstv %s778_s10  ;;  %s1202_s24 = sld [smem:[#allocation6]] }
  0x35   : > { %v256_v9 = vmul.f32 %v255_v8, %v1188_v0  ;;  %v257_v10 = vmul.f32 %v255_v8, %v1190_v1  ;;  %v267_v11 = vstv %s779_s20  ;;  %s1206_s25 = sld [smem:[#allocation2 + $0x8]] }
  0x36   : > { %v248_v13 = vrot.slane %v244_v6, 1  ;;  %v249_v14 = vrot.slane %v245_v7, 1  ;;  %v268_v15 = vmul.f32 %v267_v11, %v1188_v0  ;;  %v269_v16 = vmul.f32 %v267_v11, %v1190_v1  ;;  %s1212_s27 = sld [smem:[#allocation2 + $0x9]] }
  0x37   : > { %v260_v17 = vrot.slane %v256_v9, 2  ;;  %v261_v18 = vrot.slane %v257_v10, 2  ;;  %v279_v19 = vstv %s1186_s11  ;;  %v291_v20 = vstv %s1192_s19  ;;  %s1214_s28 = sld [smem:[#allocation2 + $0xa]]  ;;  %s776_s11 = sshll.u32 %s1178_s30, 3 }
  0x38   : > { %v252_v21 = vadd.f32 %v248_v13, %v240_v3  ;;  %v253_v22 = vadd.f32 %v249_v14, %v241_v5  ;;  %v272_v23 = vrot.slane %v268_v15, 3  ;;  %v273_v24 = vrot.slane %v269_v16, 3  ;;  %s1220_s29 = sld [smem:[#allocation2 + $0xb]] }
  0x39   : > { %v280_v25 = vmul.f32 %v279_v19, %v1188_v0  ;;  %v281_v26 = vmul.f32 %v279_v19, %v1190_v1  ;;  %v292_v27 = vmul.f32 %v291_v20, %v1188_v0  ;;  %v293_v28 = vmul.f32 %v291_v20, %v1190_v1  ;;  %s1224_s26 = sld [smem:[#allocation2 + $0xc]] }
  0x3a   : > { %v264_v29 = vadd.f32 %v260_v17, %v252_v21  ;;  %v265_v30 = vadd.f32 %v261_v18, %v253_v22  ;;  %v303_v31 = vstv %s1194_s23  ;;  %v315_v32 = vstv %s1197_s21  ;;  %s1232_s4 = sld [smem:[#allocation2 + $0xd]] }
  0x3b   : > { %v284_v33 = vrot.slane %v280_v25, 4  ;;  %v285_v34 = vrot.slane %v281_v26, 4  ;;  %v296_v35 = vrot.slane %v292_v27, 5  ;;  %v297_v36 = vrot.slane %v293_v28, 5  ;;  %s1236_s6 = sld [smem:[#allocation2 + $0xe]] }
  0x3c   : > { %v276_v37 = vadd.f32 %v272_v23, %v264_v29  ;;  %v277_v38 = vadd.f32 %v273_v24, %v265_v30  ;;  %v304_v39 = vmul.f32 %v303_v31, %v1188_v0  ;;  %v305_v40 = vmul.f32 %v303_v31, %v1190_v1  ;;  %s1244_s8 = sld [smem:[#allocation2 + $0xf]] }
  0x3d   : > { %v316_v41 = vmul.f32 %v315_v32, %v1188_v0  ;;  %v317_v42 = vmul.f32 %v315_v32, %v1190_v1  ;;  %v327_v43 = vstv %s1202_s24  ;;  %v342_v44 = vstv %s1206_s25  ;;  %s1252_s9 = sld [smem:[#allocation6 + $0x1]]  ;;  %s1280_s25 = scalar_lea.vmem [#allocation9], %s776_s11 }
  0x3e   : > { %v288_v45 = vadd.f32 %v284_v33, %v276_v37  ;;  %v289_v46 = vadd.f32 %v285_v34, %v277_v38  ;;  %v308_v47 = vrot.slane %v304_v39, 6  ;;  %v309_v48 = vrot.slane %v305_v40, 6  ;;  %s1254_s10 = sld [smem:[#allocation2 + $0x10]] }
  0x3f   : > { %v320_v49 = vrot.slane %v316_v41, 7  ;;  %v321_v50 = vrot.slane %v317_v42, 7  ;;  %v343_v51 = vmul.f32 %v342_v44, %v1188_v0  ;;  %v344_v52 = vmul.f32 %v342_v44, %v1190_v1  ;;  %s1258_s20 = sld [smem:[#allocation2 + $0x11]] }
  0x40   : > { %v300_v53 = vadd.f32 %v296_v35, %v288_v45  ;;  %v301_v54 = vadd.f32 %v297_v36, %v289_v46  ;;  %v346_v56 = vstv %s1212_s27  ;;  %v358_v57 = vstv %s1214_s28  ;;  %s1263_s19 = sld [smem:[#allocation2 + $0x12]] }
  0x41   : > { %v347_v58 = vmul.f32 %v346_v56, %v1188_v0  ;;  %v348_v59 = vmul.f32 %v346_v56, %v1190_v1  ;;  %v359_v60 = vmul.f32 %v358_v57, %v1188_v0  ;;  %v360_v61 = vmul.f32 %v358_v57, %v1190_v1  ;;  %s1265_s23 = sld [smem:[#allocation2 + $0x13]] }
  0x42   : > { %v312_v62 = vadd.f32 %v308_v47, %v300_v53  ;;  %v313_v63 = vadd.f32 %v309_v48, %v301_v54  ;;  %v370_v2 = vstv %s1220_s29  ;;  %v382_v3 = vstv %s1224_s26  ;;  %s1267_s21 = sld [smem:[#allocation2 + $0x14]] }
  0x43   : > { %v351_v4 = vrot.slane %v347_v58, 1  ;;  %v352_v5 = vrot.slane %v348_v59, 1  ;;  %v363_v6 = vrot.slane %v359_v60, 2  ;;  %v364_v7 = vrot.slane %v360_v61, 2  ;;  %s1272_s24 = sld [smem:[#allocation2 + $0x15]] }
  0x44   : > { %v324_v8 = vadd.f32 %v320_v49, %v312_v62  ;;  %v325_v9 = vadd.f32 %v321_v50, %v313_v63  ;;  %v371_v10 = vmul.f32 %v370_v2, %v1188_v0  ;;  %v372_v11 = vmul.f32 %v370_v2, %v1190_v1  ;;  %s1291_s27 = sld [smem:[#allocation2 + $0x16]] }
  0x45   : > { %v355_v12 = vadd.f32 %v351_v4, %v343_v51  ;;  %v356_v13 = vadd.f32 %v352_v5, %v344_v52  ;;  %v383_v14 = vmul.f32 %v382_v3, %v1188_v0  ;;  %v384_v15 = vmul.f32 %v382_v3, %v1190_v1  ;;  %s1295_s28 = sld [smem:[#allocation2 + $0x17]] }
  0x46   : > { %v328_v16 = vadd.f32 %v327_v43, %v324_v8  ;;  %v329_v17 = vadd.f32 %v327_v43, %v325_v9  ;;  %v375_v18 = vrot.slane %v371_v10, 3  ;;  %v376_v19 = vrot.slane %v372_v11, 3  ;;  %s1301_s29 = sld [smem:[#allocation6 + $0x2]] }
  0x47   : > { %v367_v20 = vadd.f32 %v363_v6, %v355_v12  ;;  %v368_v21 = vadd.f32 %v364_v7, %v356_v13  ;;  %v387_v22 = vrot.slane %v383_v14, 4  ;;  %v388_v23 = vrot.slane %v384_v15, 4  ;;  %s1303_s26 = sld [smem:[#allocation2 + $0x18]] }
  0x48   : > { %v332_v24 = vrot.slane %v329_v17, 7  ;;  %v394_v25 = vstv %s1232_s4  ;;  %v406_v26 = vstv %s1236_s6  ;;  %v418_v27 = vstv %s1244_s8  ;;  %s1309_s4 = sld [smem:[#allocation2 + $0x19]] }
  0x49   : > { %v379_v28 = vadd.f32 %v375_v18, %v367_v20  ;;  %v380_v29 = vadd.f32 %v376_v19, %v368_v21  ;;  %v395_v30 = vmul.f32 %v394_v25, %v1188_v0  ;;  %v396_v31 = vmul.f32 %v394_v25, %v1190_v1  ;;  %s1314_s6 = sld [smem:[#allocation2 + $0x1a]] }
  0x4a   : > { %v334_v32 = vsel %vm333_vm0, %v328_v16, %v332_v24  ;;  %v407_v33 = vmul.f32 %v406_v26, %v1188_v0  ;;  %v408_v34 = vmul.f32 %v406_v26, %v1190_v1  ;;  %v419_v35 = vmul.f32 %v418_v27, %v1188_v0  ;;  %s1318_s8 = sld [smem:[#allocation2 + $0x1b]] }
  0x4b   : > { %340 = vst.msk [vmem:[%s1280_s25] ss:$4 sm:$0x3] %vm1238_vm1, %v334_v32  ;;  %v391_v36 = vadd.f32 %v387_v22, %v379_v28  ;;  %v392_v37 = vadd.f32 %v388_v23, %v380_v29  ;;  %v399_v38 = vrot.slane %v395_v30, 5  ;;  %v400_v39 = vrot.slane %v396_v31, 5  ;;  %s1345_s11 = sld [smem:[#allocation2 + $0x1f]] }
  0x4c   : > { %v411_v40 = vrot.slane %v407_v33, 6  ;;  %v412_v41 = vrot.slane %v408_v34, 6  ;;  %v420_v42 = vmul.f32 %v418_v27, %v1190_v1  ;;  %v423_v43 = vrot.slane %v419_v35, 7 }
  0x4d   : > { %v403_v44 = vadd.f32 %v399_v38, %v391_v36  ;;  %v404_v45 = vadd.f32 %v400_v39, %v392_v37  ;;  %v430_v46 = vstv %s1252_s9  ;;  %v441_v47 = vstv %s1254_s10  ;;  %s1321_s9 = sld [smem:[#allocation2 + $0x1c]] }
  0x4e   : > { %v424_v48 = vrot.slane %v420_v42, 7  ;;  %v442_v49 = vmul.f32 %v441_v47, %v1188_v0  ;;  %v443_v50 = vmul.f32 %v441_v47, %v1190_v1  ;;  %v445_v51 = vstv %s1258_s20  ;;  %s1336_s10 = sld [smem:[#allocation2 + $0x1d]] }
  0x4f   : > { %v415_v52 = vadd.f32 %v411_v40, %v403_v44  ;;  %v416_v53 = vadd.f32 %v412_v41, %v404_v45  ;;  %v446_v54 = vmul.f32 %v445_v51, %v1188_v0  ;;  %v447_v56 = vmul.f32 %v445_v51, %v1190_v1  ;;  %s1341_s20 = sld [smem:[#allocation2 + $0x1e]] }
  0x50   : > { %v457_v57 = vstv %s1263_s19  ;;  %v469_v58 = vstv %s1265_s23  ;;  %v481_v59 = vstv %s1267_s21  ;;  %v493_v60 = vstv %s1272_s24  ;;  %s812_s19 = sld [smem:[#allocation6 + $0x3]]  ;;  %s820_s23 = sshll.u32 %s1046_s15, 3 }
  0x51   : > { %v427_v61 = vadd.f32 %v423_v43, %v415_v52  ;;  %v428_v62 = vadd.f32 %v424_v48, %v416_v53  ;;  %v450_v63 = vrot.slane %v446_v54, 1  ;;  %v451_v2 = vrot.slane %v447_v56, 1  ;;  %s639_s15 = scalar_lea.sflag [#allocation4], %s1178_s30 }
  0x52   : > { %v458_v3 = vmul.f32 %v457_v57, %v1188_v0  ;;  %v459_v4 = vmul.f32 %v457_v57, %v1190_v1  ;;  %v470_v5 = vmul.f32 %v469_v58, %v1188_v0  ;;  %v471_v6 = vmul.f32 %v469_v58, %v1190_v1 }
  0x53   : > { %v431_v7 = vadd.f32 %v430_v46, %v427_v61  ;;  %v432_v8 = vadd.f32 %v430_v46, %v428_v62  ;;  %v454_v9 = vadd.f32 %v450_v63, %v442_v49  ;;  %v455_v10 = vadd.f32 %v451_v2, %v443_v50 }
  0x54   : > { %v462_v11 = vrot.slane %v458_v3, 2  ;;  %v463_v12 = vrot.slane %v459_v4, 2  ;;  %v474_v13 = vrot.slane %v470_v5, 3  ;;  %v475_v14 = vrot.slane %v471_v6, 3 }
  0x55   : > { %v435_v15 = vrot.slane %v432_v8, 7  ;;  %v482_v16 = vmul.f32 %v481_v59, %v1188_v0  ;;  %v483_v17 = vmul.f32 %v481_v59, %v1190_v1  ;;  %v494_v18 = vmul.f32 %v493_v60, %v1188_v0 }
  0x56   : > { %v466_v19 = vadd.f32 %v462_v11, %v454_v9  ;;  %v467_v20 = vadd.f32 %v463_v12, %v455_v10  ;;  %v495_v21 = vmul.f32 %v493_v60, %v1190_v1  ;;  %v505_v22 = vstv %s1291_s27  ;;  %s652_s27 = scalar_lea.hbm %s1412_s3, %s820_s23 }
  0x57   : > { %v436_v23 = vsel %vm333_vm0, %v431_v7, %v435_v15  ;;  %v486_v24 = vrot.slane %v482_v16, 4  ;;  %v487_v25 = vrot.slane %v483_v17, 4  ;;  %v498_v26 = vrot.slane %v494_v18, 5 }
  0x58   : > { %793 = vst.msk [vmem:[%s1280_s25 + $0x1] ss:$4 sm:$0x3] %vm1238_vm1, %v436_v23  ;;  %v478_v27 = vadd.f32 %v474_v13, %v466_v19  ;;  %v479_v28 = vadd.f32 %v475_v14, %v467_v20  ;;  %v499_v29 = vrot.slane %v495_v21, 5  ;;  %v506_v30 = vmul.f32 %v505_v22, %v1188_v0 }
  0x59   : > { %v507_v31 = vmul.f32 %v505_v22, %v1190_v1  ;;  %v517_v32 = vstv %s1295_s28  ;;  %v529_v33 = vstv %s1301_s29  ;;  %v540_v34 = vstv %s1303_s26  ;;  %s654_s28 = sshll.u32 %s1280_s25, 4  ;;  %s656_s29 = sshll.u32 %s652_s27, 4  ;;  %s655_s28 = int_to_ptr.vmem [resolvable:$true] %s654_s28  ;;  %s657_s29 = int_to_ptr.hbm [resolvable:$true] %s656_s29 }
  0x5a   : > { %v490_v35 = vadd.f32 %v486_v24, %v478_v27  ;;  %v491_v36 = vadd.f32 %v487_v25, %v479_v28  ;;  %v510_v37 = vrot.slane %v506_v30, 6  ;;  %v518_v38 = vmul.f32 %v517_v32, %v1188_v0  ;;  %s978_s26 = sshra.s32 %s657_s29, 4  ;;  %s979_s26 = int_to_ptr.hbm [resolvable:$true] %s978_s26 }
  0x5b   : > { %v511_v39 = vrot.slane %v507_v31, 6  ;;  %v519_v40 = vmul.f32 %v517_v32, %v1190_v1  ;;  %v541_v41 = vmul.f32 %v540_v34, %v1188_v0  ;;  %v542_v42 = vmul.f32 %v540_v34, %v1190_v1  ;;  %p985_p11 = scmp.lt.s32.totalorder %s979_s26, %s1412_s3 }
  0x5c   : > { %v502_v43 = vadd.f32 %v498_v26, %v490_v35  ;;  %v503_v44 = vadd.f32 %v499_v29, %v491_v36  ;;  %v522_v45 = vrot.slane %v518_v38, 7  ;;  %v544_v46 = vstv %s1309_s4  ;;  %s980_s4 = scalar_lea.hbm %s979_s26, 8 }
  0x5d   : > { %v523_v47 = vrot.slane %v519_v40, 7  ;;  %v545_v48 = vmul.f32 %v544_v46, %v1188_v0  ;;  %v546_v49 = vmul.f32 %v544_v46, %v1190_v1  ;;  %v556_v50 = vstv %s1314_s6  ;;  %p981_p1 = scmp.ne.s32.totalorder %s979_s26, %s980_s4 }
  0x5e   : > { %v514_v51 = vadd.f32 %v510_v37, %v502_v43  ;;  %v515_v52 = vadd.f32 %v511_v39, %v503_v44  ;;  %v557_v53 = vmul.f32 %v556_v50, %v1188_v0  ;;  %v558_v54 = vmul.f32 %v556_v50, %v1190_v1 }
  0x5f   : > { %v549_v56 = vrot.slane %v545_v48, 1  ;;  %v550_v57 = vrot.slane %v546_v49, 1  ;;  %v568_v58 = vstv %s1318_s8  ;;  %v580_v59 = vstv %s1321_s9  ;;  %p982_p3 = pnand %p981_p1, %p1150_p2  ;;  %s984_s9 = scalar_lea.hbm %s1412_s3, 16 }
  0x60   : > { %v526_v60 = vadd.f32 %v522_v45, %v514_v51  ;;  %v527_v61 = vadd.f32 %v523_v47, %v515_v52  ;;  %v561_v62 = vrot.slane %v557_v53, 2  ;;  %v562_v63 = vrot.slane %v558_v54, 2  ;;  %p986_p12 = scmp.lt.s32.totalorder %s984_s9, %s980_s4 }
  0x61   : > { %v553_v2 = vadd.f32 %v549_v56, %v541_v41  ;;  %v554_v3 = vadd.f32 %v550_v57, %v542_v42  ;;  %v569_v4 = vmul.f32 %v568_v58, %v1188_v0  ;;  %v570_v5 = vmul.f32 %v568_v58, %v1190_v1  ;;  %p983_p7 = pneg %p982_p3 }
  0x62   : > { %v530_v6 = vadd.f32 %v529_v33, %v526_v60  ;;  %v531_v7 = vadd.f32 %v529_v33, %v527_v61  ;;  %v581_v8 = vmul.f32 %v580_v59, %v1188_v0  ;;  %v582_v9 = vmul.f32 %v580_v59, %v1190_v1  ;;  %p987_p13 = por %p986_p12, %p985_p11 }
  0x63   : > { %v565_v10 = vadd.f32 %v561_v62, %v553_v2  ;;  %v566_v11 = vadd.f32 %v562_v63, %v554_v3  ;;  %v573_v12 = vrot.slane %v569_v4, 3  ;;  %v574_v13 = vrot.slane %v570_v5, 3 }
  0x64   : > { %v534_v14 = vrot.slane %v531_v7, 7  ;;  %v585_v15 = vrot.slane %v581_v8, 4  ;;  %v586_v16 = vrot.slane %v582_v9, 4  ;;  %v592_v17 = vstv %s1336_s10  ;;  %p988_p0 = pnand %p987_p13, %p983_p7 }
  0x65   : > { %v577_v18 = vadd.f32 %v573_v12, %v565_v10  ;;  %v578_v19 = vadd.f32 %v574_v13, %v566_v11  ;;  %v593_v20 = vmul.f32 %v592_v17, %v1188_v0  ;;  %v594_v21 = vmul.f32 %v592_v17, %v1190_v1 }
  0x66   : > { %v535_v22 = vsel %vm333_vm0, %v530_v6, %v534_v14  ;;  %v604_v23 = vstv %s1341_s20  ;;  %v616_v24 = vstv %s1345_s11  ;;  %v628_v41 = vstv %s812_s19 }
  0x67   : > { %803 = vst.msk [vmem:[%s1280_s25 + $0x2] ss:$4 sm:$0x3] %vm1238_vm1, %v535_v22  ;;  %v589_v25 = vadd.f32 %v585_v15, %v577_v18  ;;  %v590_v26 = vadd.f32 %v586_v16, %v578_v19  ;;  %v597_v27 = vrot.slane %v593_v20, 5  ;;  %v598_v28 = vrot.slane %v594_v21, 5 }
  0x68   : > { %v605_v29 = vmul.f32 %v604_v23, %v1188_v0  ;;  %v606_v30 = vmul.f32 %v604_v23, %v1190_v1  ;;  %v617_v31 = vmul.f32 %v616_v24, %v1188_v0  ;;  %v618_v32 = vmul.f32 %v616_v24, %v1190_v1 }
  0x69   : > { %v601_v33 = vadd.f32 %v597_v27, %v589_v25  ;;  %v602_v34 = vadd.f32 %v598_v28, %v590_v26 }
  0x6a   : > { %v609_v35 = vrot.slane %v605_v29, 6  ;;  %v610_v36 = vrot.slane %v606_v30, 6  ;;  %v621_v37 = vrot.slane %v617_v31, 7  ;;  %v622_v38 = vrot.slane %v618_v32, 7 }
  0x6c   : > { %v613_v39 = vadd.f32 %v609_v35, %v601_v33  ;;  %v614_v40 = vadd.f32 %v610_v36, %v602_v34 }
  0x6e   : > { %v625_v0 = vadd.f32 %v621_v37, %v613_v39  ;;  %v626_v1 = vadd.f32 %v622_v38, %v614_v40 }
  0x70   : > { %v629_v42 = vadd.f32 %v628_v41, %v625_v0  ;;  %v630_v43 = vadd.f32 %v628_v41, %v626_v1 }
  0x72   : > { %v633_v44 = vrot.slane %v630_v43, 7 }
  0x74   : > { %v634_v45 = vsel %vm333_vm0, %v629_v42, %v633_v44 }
  0x75   : > { %813 = vst.msk [vmem:[%s1280_s25 + $0x3] ss:$4 sm:$0x3] %vm1238_vm1, %v634_v45 }
  0x76   : > { %991 = shalt.err (!%p988_p0)
}
  0x77   : > { %831 = dma.vmem_to_hbm [thread:$0]  (%p1150_p2), %s655_s28, 128, %s657_s29, %s639_s15  }
  0x78 PF: > { %s668_s30 = sand.u32 1, %s1034_s12   ;;  %p845_p4 = pnand %p768_p8, %p1123_p5 }
  0x79   : > { %s669_s25 = scalar_lea.sflag [#allocation4], %s668_s30 }
  0x7a   : > { %p846_p6 = pneg %p845_p4 }
  0x7c   : > { %1029 = dma.done.wait (%p846_p6), %s669_s25, 128  }
  0x7d   : > { %1031 = vsyncadd (%p846_p6), %s669_s25, 4294967168  ;;  %s21_s17 = sadd.s32 1, %s1054_s17   ;;  %s1420_s12 = smov %s1038_s13 }
  0x7e   : > { %p18_p9 = scmp.ge.s32.totalorder %s21_s17, 4   ;;  %s1421_s13 = smov %s1042_s14 }
  0x7f   : > { %s1422_s14 = smov %s1160_s18  ;;  %s1423_s15 = smov %s1050_s16 }
  0x80   : > { %s1424_s16 = smov %s1426_s5  ;;  %20 = sbr.rel (!%p18_p9) target bundleno = 8 (0x8), region = 89 }
  0x85   :  { %675 = vsyncpa [#allocation3], 1 }
  0x86   :  { %677 = vsyncpa [#allocation3 + $0x1], 1 }
  0x87   :  { %678 = vsyncpa [#allocation4], 1 }
  0x88   :  { %680 = vsyncpa [#allocation4 + $0x1], 1 }
  0x89   :  { %681 = vsyncpa [#allocation5], 1 }
  0x8a   :  { %683 = vsyncpa [#allocation5 + $0x1], 1 }
  0x8b   :  { %684 = vsyncpa [#allocation7], 1 }

</bundles_post_ra>
